<compile_context>
chip_gen: v7x
topology: tpu7x:2x2x1
jax: 0.10.0
libtpu: 0.0.40
codegen_flags: <defaults>
</compile_context>

<pallas_src>
import functools
import math

import numpy as np
import jax
import jax.numpy as jnp
from jax import lax
from jax.experimental import pallas as pl
from jax.experimental.pallas import tpu as pltpu

BN_EPS = 1e-5
BN_SCALE = 1.0 / math.sqrt(1.0 + BN_EPS)   # gamma / sqrt(running_var + eps) with identity stats
MAX_SINGLE_K = 2560                         # largest contraction kept as a single K block
TM = 512                                    # matmul output-row tile
ROW_TILE = 1024                             # row tile for elementwise kernels


# ----------------------------------------------------------------------------
# Pallas kernels
# ----------------------------------------------------------------------------
def _mm_kernel(x_ref, w_ref, s_ref, b_ref, a_ref, o_ref, acc_ref, *, act):
    """out = act((x @ w) * scale + bias); bf16 MXU inputs, f32 VMEM accumulator."""
    k = pl.program_id(2)

    @pl.when(k == 0)
    def _():
        acc_ref[...] = jnp.zeros_like(acc_ref)

    acc_ref[...] += jnp.dot(x_ref[...], w_ref[...],
                            preferred_element_type=jnp.float32)

    @pl.when(k == pl.num_programs(2) - 1)
    def _():
        y = acc_ref[...] * s_ref[...] + b_ref[...]
        if act == "relu":
            y = jnp.maximum(y, 0.0)
        elif act == "sigmoid":
            y = 1.0 / (1.0 + jnp.exp(-y))
        elif act == "prelu":
            y = jnp.where(y > 0, y, a_ref[...] * y)   # learned slope passed as an operand
        o_ref[...] = y.astype(o_ref.dtype)


def _add_relu_kernel(a_ref, b_ref, o_ref):
    y = a_ref[...].astype(jnp.float32) + b_ref[...].astype(jnp.float32)
    o_ref[...] = jnp.maximum(y, 0.0).astype(o_ref.dtype)


def _maxpool_kernel(x_ref, o_ref):
    o_ref[...] = jnp.max(x_ref[...], axis=0)


def _avgpool_kernel(x_ref, o_ref, *, inv):
    s = pl.program_id(1)

    @pl.when(s == 0)
    def _():
        o_ref[...] = jnp.zeros_like(o_ref)

    o_ref[...] += jnp.sum(x_ref[...].astype(jnp.float32), axis=1, keepdims=True)

    @pl.when(s == pl.num_programs(1) - 1)
    def _():
        o_ref[...] = o_ref[...] * inv


def _lerp_kernel(a_ref, b_ref, w_ref, o_ref, *, act):
    a = a_ref[...].astype(jnp.float32)
    b = b_ref[...].astype(jnp.float32)
    y = a + w_ref[...] * (b - a)
    if act == "sigmoid":
        y = 1.0 / (1.0 + jnp.exp(-y))
    o_ref[...] = y.astype(o_ref.dtype)


def _coattn_kernel(rq_ref, cq_ref, kv_ref, f0_ref, f1_ref, *, scale):
    """feats_0 / feats_1 of the reference: softmax(C^-0.5 Q K^T) V with K=V=curr."""
    kv = kv_ref[0]                                        # (M, C) bf16

    def attend(q):                                        # q: (tq, C)
        s = scale * lax.dot_general(q, kv, (((1,), (1,)), ((), ())),
                                    preferred_element_type=jnp.float32)
        m = jnp.max(s, axis=-1, keepdims=True)
        e = jnp.exp(s - m)
        p = e / jnp.sum(e, axis=-1, keepdims=True)
        return jnp.dot(p.astype(kv.dtype), kv, preferred_element_type=jnp.float32)

    f0_ref[0] = attend(rq_ref[0]).astype(f0_ref.dtype)
    f1_ref[0] = attend(cq_ref[0]).astype(f1_ref.dtype)


def _pool3_kernel(a_ref, b_ref, c_ref, o_ref, *, inv):
    s = (a_ref[0].astype(jnp.float32) + b_ref[0].astype(jnp.float32)
         + c_ref[0].astype(jnp.float32))
    o_ref[0] = jnp.sum(s, axis=0, keepdims=True) * inv


def _combine_kernel(f0_ref, f1_ref, cur_ref, a_ref, o_ref):
    a = a_ref[0]                                          # (3, C) f32
    y = (f0_ref[0].astype(jnp.float32) * a[0:1, :]
         + f1_ref[0].astype(jnp.float32) * a[1:2, :]
         + cur_ref[0].astype(jnp.float32) * a[2:3, :])
    o_ref[0] = y.astype(o_ref.dtype)


def _heat_kernel(mw_ref, mb_ref, g_ref, h2_ref, o_ref):
    def sig(t):
        return 1.0 / (1.0 + jnp.exp(-t.astype(jnp.float32)))
    o_ref[...] = (sig(mw_ref[...]) * g_ref[...].astype(jnp.float32)
                  + sig(mb_ref[...]) + h2_ref[...].astype(jnp.float32))


# ----------------------------------------------------------------------------
# Pallas wrappers
# ----------------------------------------------------------------------------
def _pick_tn(Np):
    for cand in (512, 256, 128):
        if Np % cand == 0:
            return cand
    return 128


def matmul_bias_act(x, w, scale=None, bias=None, act=None, prelu_w=None,
                    out_dtype=jnp.bfloat16):
    """x:(M,K) @ w:(K,N) with fused per-column scale/bias + activation (bf16/f32-acc)."""
    M, K = x.shape
    _, N = w.shape
    x = x.astype(jnp.bfloat16)
    w = w.astype(jnp.bfloat16)

    scale = jnp.ones((N,), jnp.float32) if scale is None else scale.astype(jnp.float32)
    bias = jnp.zeros((N,), jnp.float32) if bias is None else bias.astype(jnp.float32)
    aslope = jnp.zeros((N,), jnp.float32) if prelu_w is None else prelu_w.astype(jnp.float32)

    # Lane-dense outputs: pad N to a multiple of 128 (weight/scale only; x untouched).
    Np = ((N + 127) // 128) * 128
    if Np != N:
        w = jnp.pad(w, ((0, 0), (0, Np - N)))
        scale = jnp.pad(scale, (0, Np - N))
        bias = jnp.pad(bias, (0, Np - N))
        aslope = jnp.pad(aslope, (0, Np - N))

    # K tiling: avoid padding whenever a clean 128-multiple tile divides K.
    if K <= MAX_SINGLE_K:
        tk, nk = K, 1
    else:
        for cand in (512, 384, 256, 128):
            if K % cand == 0:
                tk, nk = cand, K // cand
                break
        else:
            Kp = ((K + 511) // 512) * 512
            x = jnp.pad(x, ((0, 0), (0, Kp - K)))
            w = jnp.pad(w, ((0, Kp - K), (0, 0)))
            tk, nk = 512, Kp // 512

    tm = M if M <= TM else TM
    gm = pl.cdiv(M, tm)
    tn = _pick_tn(Np)
    gn = Np // tn

    out = pl.pallas_call(
        functools.partial(_mm_kernel, act=act),
        out_shape=jax.ShapeDtypeStruct((M, Np), out_dtype),
        grid_spec=pltpu.PrefetchScalarGridSpec(
            num_scalar_prefetch=0,
            grid=(gm, gn, nk),
            in_specs=[
                pl.BlockSpec((tm, tk), lambda i, j, k: (i, k)),
                pl.BlockSpec((tk, tn), lambda i, j, k: (k, j)),
                pl.BlockSpec((1, tn), lambda i, j, k: (0, j)),
                pl.BlockSpec((1, tn), lambda i, j, k: (0, j)),
                pl.BlockSpec((1, tn), lambda i, j, k: (0, j)),
            ],
            out_specs=pl.BlockSpec((tm, tn), lambda i, j, k: (i, j)),
            scratch_shapes=[pltpu.VMEM((tm, tn), jnp.float32)],
        ),
        compiler_params=pltpu.CompilerParams(
            dimension_semantics=("parallel", "parallel", "arbitrary")),
    )(x, w, scale.reshape(1, Np), bias.reshape(1, Np), aslope.reshape(1, Np))
    return out[:, :N] if Np != N else out


def add_relu(a, b):
    N, H, W, C = a.shape
    M = N * H * W
    a2 = a.reshape(M, C)
    b2 = b.reshape(M, C)
    tm = M if M <= ROW_TILE else ROW_TILE
    gm = pl.cdiv(M, tm)
    out = pl.pallas_call(
        _add_relu_kernel,
        out_shape=jax.ShapeDtypeStruct((M, C), a.dtype),
        grid_spec=pltpu.PrefetchScalarGridSpec(
            num_scalar_prefetch=0, grid=(gm,),
            in_specs=[pl.BlockSpec((tm, C), lambda i: (i, 0)),
                      pl.BlockSpec((tm, C), lambda i: (i, 0))],
            out_specs=pl.BlockSpec((tm, C), lambda i: (i, 0))),
        compiler_params=pltpu.CompilerParams(dimension_semantics=("parallel",)),
    )(a2, b2)
    return out.reshape(N, H, W, C)


def maxpool_3x3_s2_p1_ceil(x):
    """nn.MaxPool2d(kernel_size=3, stride=2, padding=1, ceil_mode=True)."""
    N, H, W, C = x.shape
    k, s, p = 3, 2, 1

    def out_sz(L):
        o = -(-(L + 2 * p - k) // s) + 1          # ceil mode
        if (o - 1) * s >= L + p:                  # PyTorch last-window rule
            o -= 1
        return o

    Ho, Wo = out_sz(H), out_sz(W)
    ph = max((Ho - 1) * s + k - H - p, 0)
    pw = max((Wo - 1) * s + k - W - p, 0)
    xp = jnp.pad(x, ((0, 0), (p, ph), (p, pw), (0, 0)), constant_values=-jnp.inf)
    # TODO(synk): the 9 shifted windows are still materialized in HBM by XLA; a direct
    # pooling kernel reading the padded map via manual DMA would cut ~9x the traffic.
    wins = []
    for dy in range(k):
        for dx in range(k):
            wins.append(xp[:, dy:dy + (Ho - 1) * s + 1:s,
                           dx:dx + (Wo - 1) * s + 1:s, :])
    M = N * Ho * Wo
    stacked = jnp.stack(wins, axis=0).reshape(k * k, M, C)
    tm = M if M <= ROW_TILE else ROW_TILE
    gm = pl.cdiv(M, tm)
    out = pl.pallas_call(
        _maxpool_kernel,
        out_shape=jax.ShapeDtypeStruct((M, C), x.dtype),
        grid_spec=pltpu.PrefetchScalarGridSpec(
            num_scalar_prefetch=0, grid=(gm,),
            in_specs=[pl.BlockSpec((k * k, tm, C), lambda i: (0, i, 0))],
            out_specs=pl.BlockSpec((tm, C), lambda i: (i, 0))),
        compiler_params=pltpu.CompilerParams(dimension_semantics=("parallel",)),
    )(stacked)
    return out.reshape(N, Ho, Wo, C)


def avgpool_global(x):
    N, H, W, C = x.shape
    HW = H * W
    x2 = x.reshape(N, HW, C)
    if HW <= 2048:
        ts = HW
    else:
        parts = pl.cdiv(HW, 2048)
        while HW % parts:
            parts += 1
        ts = HW // parts
    gs = HW // ts
    out = pl.pallas_call(
        functools.partial(_avgpool_kernel, inv=1.0 / HW),
        out_shape=jax.ShapeDtypeStruct((N, 1, C), jnp.float32),
        grid_spec=pltpu.PrefetchScalarGridSpec(
            num_scalar_prefetch=0, grid=(N, gs),
            in_specs=[pl.BlockSpec((1, ts, C), lambda b, s: (b, s, 0))],
            out_specs=pl.BlockSpec((1, 1, C), lambda b, s: (b, 0, 0))),
        compiler_params=pltpu.CompilerParams(
            dimension_semantics=("parallel", "arbitrary")),
    )(x2)
    return out.reshape(N, C)


# ----------------------------------------------------------------------------
# Convolution via im2col + fused Pallas matmul
# ----------------------------------------------------------------------------
def extract_patches(x, kh, kw, stride, padding, dilation):
    N, H, W, C = x.shape
    Ho = (H + 2 * padding - dilation * (kh - 1) - 1) // stride + 1
    Wo = (W + 2 * padding - dilation * (kw - 1) - 1) // stride + 1
    xp = jnp.pad(x, ((0, 0), (padding, padding), (padding, padding), (0, 0)))
    cols = []
    for dy in range(kh):
        for dx in range(kw):
            y0, x0 = dy * dilation, dx * dilation
            cols.append(xp[:, y0:y0 + (Ho - 1) * stride + 1:stride,
                           x0:x0 + (Wo - 1) * stride + 1:stride, :])
    return jnp.concatenate(cols, axis=-1), Ho, Wo


def conv_bn_act(x, w, conv_bias=None, use_bn=True, stride=1, padding=0,
                dilation=1, act=None, prelu_w=None):
    """w: PyTorch layout (Cout, Cin, kh, kw); BN folded to scale/bias (identity stats)."""
    Cout, Cin, kh, kw = w.shape
    N = x.shape[0]
    x = x.astype(jnp.bfloat16)
    patches, Ho, Wo = extract_patches(x, kh, kw, stride, padding, dilation)
    wmat = jnp.transpose(w, (2, 3, 1, 0)).reshape(kh * kw * Cin, Cout)

    cb = conv_bias if conv_bias is not None else jnp.zeros((Cout,), jnp.float32)
    if use_bn:
        scale = jnp.full((Cout,), BN_SCALE, jnp.float32)
        bias = cb * BN_SCALE
    else:
        scale = jnp.ones((Cout,), jnp.float32)
        bias = cb

    out = matmul_bias_act(patches.reshape(N * Ho * Wo, kh * kw * Cin),
                          wmat, scale, bias, act=act, prelu_w=prelu_w)
    return out.reshape(N, Ho, Wo, Cout)


# ----------------------------------------------------------------------------
# Bilinear resize: separable lerp with C kept lane-dense (VPU kernel)
# ----------------------------------------------------------------------------
def _lerp_rows(a2, b2, w2, act, out_dtype):
    M, L = a2.shape
    tm = M if M <= ROW_TILE else ROW_TILE
    gm = pl.cdiv(M, tm)
    if w2.shape[0] == 1:                 # per-lane weights, shared across rows
        wspec = pl.BlockSpec((1, L), lambda i: (0, 0))
    else:                                # per-row weights, shared across lanes
        wspec = pl.BlockSpec((tm, 1), lambda i: (i, 0))
    return pl.pallas_call(
        functools.partial(_lerp_kernel, act=act),
        out_shape=jax.ShapeDtypeStruct((M, L), out_dtype),
        grid_spec=pltpu.PrefetchScalarGridSpec(
            num_scalar_prefetch=0, grid=(gm,),
            in_specs=[pl.BlockSpec((tm, L), lambda i: (i, 0)),
                      pl.BlockSpec((tm, L), lambda i: (i, 0)),
                      wspec],
            out_specs=pl.BlockSpec((tm, L), lambda i: (i, 0))),
        compiler_params=pltpu.CompilerParams(dimension_semantics=("parallel",)),
    )(a2, b2, w2)


def _bilinear_coeffs(out_size, in_size, align_corners):
    i0 = np.zeros((out_size,), np.int32)
    i1 = np.zeros((out_size,), np.int32)
    lam = np.zeros((out_size,), np.float32)
    for o in range(out_size):
        if align_corners:
            src = 0.0 if out_size == 1 else o * (in_size - 1) / (out_size - 1)
        else:
            src = (o + 0.5) * in_size / out_size - 0.5
            src = max(src, 0.0)
        lo = min(int(np.floor(src)), in_size - 1)
        hi = min(lo + 1, in_size - 1)
        i0[o], i1[o], lam[o] = lo, hi, src - lo
    return i0, i1, lam


def bilinear_resize(x, out_h, out_w, align_corners=False, act=None, out_dtype=None):
    N, H, W, C = x.shape
    out_dtype = x.dtype if out_dtype is None else out_dtype
    if H == 1 and W == 1:                # broadcast case (ASPP image feature, align_corners=True)
        y = jnp.broadcast_to(x, (N, out_h, out_w, C))
        if act == "sigmoid":
            y = jax.nn.sigmoid(y.astype(jnp.float32))
        return y.astype(out_dtype)

    y0, y1, wy = _bilinear_coeffs(out_h, H, align_corners)
    x0, x1, wx = _bilinear_coeffs(out_w, W, align_corners)

    a = jnp.take(x, jnp.asarray(y0), axis=1).reshape(N * out_h, W * C)
    b = jnp.take(x, jnp.asarray(y1), axis=1).reshape(N * out_h, W * C)
    wcol = jnp.tile(jnp.asarray(wy), N).reshape(N * out_h, 1)
    z = _lerp_rows(a, b, wcol, act=None, out_dtype=x.dtype).reshape(N, out_h, W, C)

    a = jnp.take(z, jnp.asarray(x0), axis=2).reshape(N * out_h, out_w * C)
    b = jnp.take(z, jnp.asarray(x1), axis=2).reshape(N * out_h, out_w * C)
    wrow = jnp.repeat(jnp.asarray(wx), C).reshape(1, out_w * C)
    out = _lerp_rows(a, b, wrow, act=act, out_dtype=out_dtype)
    return out.reshape(N, out_h, out_w, C)


# ----------------------------------------------------------------------------
# Co-attention / attention heads
# ----------------------------------------------------------------------------
def coattention(ref_mc, cur_mc):
    B, M, C = cur_mc.shape
    tq = M if M <= 512 else 256
    gq = pl.cdiv(M, tq)
    # TODO(synk): K/V held whole per block; flash-style K/V tiling needed only for huge h*w.
    f0, f1 = pl.pallas_call(
        functools.partial(_coattn_kernel, scale=float(C) ** -0.5),
        out_shape=(jax.ShapeDtypeStruct((B, M, C), jnp.bfloat16),
                   jax.ShapeDtypeStruct((B, M, C), jnp.bfloat16)),
        grid_spec=pltpu.PrefetchScalarGridSpec(
            num_scalar_prefetch=0, grid=(B, gq),
            in_specs=[pl.BlockSpec((1, tq, C), lambda b, q: (b, q, 0)),
                      pl.BlockSpec((1, tq, C), lambda b, q: (b, q, 0)),
                      pl.BlockSpec((1, M, C), lambda b, q: (b, 0, 0))],
            out_specs=[pl.BlockSpec((1, tq, C), lambda b, q: (b, q, 0)),
                       pl.BlockSpec((1, tq, C), lambda b, q: (b, q, 0))]),
        compiler_params=pltpu.CompilerParams(
            dimension_semantics=("parallel", "parallel")),
    )(ref_mc.astype(jnp.bfloat16), cur_mc.astype(jnp.bfloat16),
      cur_mc.astype(jnp.bfloat16))
    return f0, f1


def pooled_sum3_mean(a, b, c):
    B, M, C = a.shape
    out = pl.pallas_call(
        functools.partial(_pool3_kernel, inv=1.0 / M),
        out_shape=jax.ShapeDtypeStruct((B, 1, C), jnp.float32),
        grid_spec=pltpu.PrefetchScalarGridSpec(
            num_scalar_prefetch=0, grid=(B,),
            in_specs=[pl.BlockSpec((1, M, C), lambda i: (i, 0, 0)),
                      pl.BlockSpec((1, M, C), lambda i: (i, 0, 0)),
                      pl.BlockSpec((1, M, C), lambda i: (i, 0, 0))],
            out_specs=pl.BlockSpec((1, 1, C), lambda i: (i, 0, 0))),
        compiler_params=pltpu.CompilerParams(dimension_semantics=("parallel",)),
    )(a, b, c)
    return out.reshape(B, C)


def attention_combine(f0, f1, cur, att):
    B, M, C = f0.shape
    tm = M if M <= ROW_TILE else ROW_TILE
    gm = pl.cdiv(M, tm)
    return pl.pallas_call(
        _combine_kernel,
        out_shape=jax.ShapeDtypeStruct((B, M, C), jnp.bfloat16),
        grid_spec=pltpu.PrefetchScalarGridSpec(
            num_scalar_prefetch=0, grid=(B, gm),
            in_specs=[pl.BlockSpec((1, tm, C), lambda b, m: (b, m, 0)),
                      pl.BlockSpec((1, tm, C), lambda b, m: (b, m, 0)),
                      pl.BlockSpec((1, tm, C), lambda b, m: (b, m, 0)),
                      pl.BlockSpec((1, 3, C), lambda b, m: (b, 0, 0))],
            out_specs=pl.BlockSpec((1, tm, C), lambda b, m: (b, m, 0))),
        compiler_params=pltpu.CompilerParams(
            dimension_semantics=("parallel", "parallel")),
    )(f0, f1, cur, att)


def heat_combine(mw, mb, g, h2):
    B, H, W, _ = mw.shape
    L = H * W
    out = pl.pallas_call(
        _heat_kernel,
        out_shape=jax.ShapeDtypeStruct((B, L), jnp.float32),
    )(mw.reshape(B, L), mb.reshape(B, L), g.reshape(B, L), h2.reshape(B, L))
    return out.reshape(B, H, W, 1)


def channel_attention(pooled, params):
    C = pooled.shape[1]
    hidden = params["ca1_w"].shape[0]
    w1 = params["ca1_w"].reshape(hidden, C).T
    h = matmul_bias_act(pooled, w1,
                        scale=jnp.full((hidden,), BN_SCALE, jnp.float32),
                        bias=jnp.zeros((hidden,), jnp.float32), act="relu")
    w2 = params["ca2_w"].reshape(3 * C, hidden).T
    logits = matmul_bias_act(h, w2, act=None)
    att = jax.nn.softmax(logits.astype(jnp.float32).reshape(-1, 3, C), axis=1)
    return att                                                        # (B, 3, C) f32


# ----------------------------------------------------------------------------
# Model: Bottleneck / layers / ASPP / ResNet / Upsample_module / CoattentionModel
# ----------------------------------------------------------------------------
def bottleneck_forward(x, p):
    out = conv_bn_act(x, p["w1"], None, True, stride=p["stride"], act="relu")
    out = conv_bn_act(out, p["w2"], None, True, stride=1,
                      padding=p["dilation"], dilation=p["dilation"], act="relu")
    out = conv_bn_act(out, p["w3"], None, True, act=None)
    if "wd" in p:
        res = conv_bn_act(x, p["wd"], None, True, stride=p["stride"], act=None)
    else:
        res = x
    return add_relu(out, res)


def layer_forward(x, blocks):
    for bp in blocks:
        x = bottleneck_forward(x, bp)
    return x


def aspp_forward(x, p):
    N, H, W, C = x.shape  # C == 2048
    pooled = avgpool_global(x).reshape(N, 1, 1, C)
    img = conv_bn_act(pooled, p["conv_w"], p["conv_b"], True, act="relu")
    img = jnp.broadcast_to(img, (N, H, W, img.shape[-1]))        # bilinear from 1x1 == broadcast

    o0 = conv_bn_act(x, p["w0"], p["b0"], True, act="relu")
    o1 = conv_bn_act(x, p["w1"], p["b1"], True, padding=6, dilation=6, act="relu")
    o2 = conv_bn_act(x, p["w2"], p["b2"], True, padding=12, dilation=12, act="relu")
    o3 = conv_bn_act(x, p["w3"], p["b3"], True, padding=18, dilation=18, act="relu")

    cat = jnp.concatenate([img, o0, o1, o2, o3], axis=-1)
    out = conv_bn_act(cat, p["bw"], p["bb"], True, padding=1,
                      act="prelu", prelu_w=p["prelu_w"])
    return out


def encoder_forward(params, x_nchw, with_prob=True):
    in_h, in_w = x_nchw.shape[2], x_nchw.shape[3]
    x = jnp.transpose(x_nchw, (0, 2, 3, 1)).astype(jnp.bfloat16)  # -> NHWC

    x = conv_bn_act(x, params["conv1_w"], None, True, stride=2, padding=3, act="relu")
    x = maxpool_3x3_s2_p1_ceil(x)

    x1 = layer_forward(x, params["layer1"])
    x2 = layer_forward(x1, params["layer2"])
    x3 = layer_forward(x2, params["layer3"])
    x4 = layer_forward(x3, params["layer4"])

    fea = aspp_forward(x4, params["aspp"])

    prob = None
    if with_prob:
        logits = conv_bn_act(fea, params["cls_w"], params["cls_b"], use_bn=False, act=None)
        prob = bilinear_resize(logits, in_h, in_w, align_corners=False,
                               act="sigmoid", out_dtype=jnp.float32)   # sigmoid(upsample(logits))
    return fea, prob, [x4, x3, x2, x1]


def upsample_module_forward(layers_nhwc, p):
    x4, x3, x2, x1 = layers_nhwc
    out = conv_bn_act(x4, p["u1_skip"], None, True, act="relu")
    for xk, wskip, wup in ((x3, p["u2_skip"], p["u2_up"]),
                           (x2, p["u3_skip"], p["u3_up"]),
                           (x1, p["u4_skip"], p["u4_up"])):
        skip = conv_bn_act(xk, wskip, None, True, act=None)
        up = bilinear_resize(out, xk.shape[1], xk.shape[2], align_corners=False)
        up = conv_bn_act(up, wup, None, True, act=None)
        out = add_relu(skip, up)
    cross = conv_bn_act(out, p["u4_cross"], None, True, act="relu")
    return cross                                                   # (B, h1, w1, 64)


def make_gauss(input_size, ct, scale=15.0):
    H, W = input_size
    xs = jnp.arange(W, dtype=jnp.float32)[None, None, :]
    ys = jnp.arange(H, dtype=jnp.float32)[None, :, None]
    cx = ct[:, 0].astype(jnp.float32)[:, None, None]
    cy = ct[:, 1].astype(jnp.float32)[:, None, None]
    g = jnp.exp(-((xs - cx) ** 2 + (ys - cy) ** 2) / (2.0 * scale * scale))
    return g[..., None]                                            # (B, H, W, 1) NHWC


def coattention_forward(params, input1, previous, input2, ct, input_guass):
    del previous                                                   # unused by the reference forward
    in_h, in_w = input1.shape[2], input1.shape[3]

    # `temp` is overwritten by the second encoder pass in the reference, so the first
    # pass' classifier/upsample branch is dead and elided.
    ref_fea, _, _ref_layers = encoder_forward(params, input1, with_prob=False)
    curr_fea, temp, curr_layers = encoder_forward(params, input2, with_prob=True)
    B, h, w, C = curr_fea.shape
    M = h * w

    # torch_make_gauss + interpolate: the resulting `motion` tensor is never consumed by
    # the reference forward; computed only to mirror it.
    gauss = make_gauss((in_h, in_w), ct, scale=15.0)
    _motion = bilinear_resize(gauss.astype(jnp.bfloat16), h, w,
                              align_corners=False).reshape(B, 1, M)

    curr_upheat = upsample_module_forward(curr_layers, params["ups"])       # (B, h1, w1, 64)
    g_nhwc = jnp.transpose(input_guass, (0, 2, 3, 1)).astype(jnp.bfloat16)  # (B, h1, w1, 1)
    upheat = jnp.concatenate([curr_upheat, g_nhwc], axis=-1)                # 65 channels
    mw = conv_bn_act(upheat, params["mw_w"], params["mw_b"], use_bn=False, act=None)
    mb = conv_bn_act(upheat, params["mb_w"], params["mb_b"], use_bn=False, act=None)
    fc_h = conv_bn_act(curr_upheat, params["fc0_w"], params["fc0_b"],
                       use_bn=False, padding=1, act="relu")
    heat2 = conv_bn_act(fc_h, params["fc1_w"], params["fc1_b"], use_bn=False, act=None)
    heat = heat_combine(mw, mb, g_nhwc, heat2)                              # sigmoid fused here

    # co-attention ((B, M, C) layout == permuted (B, C, M) of the reference)
    ref_mc = ref_fea.reshape(B, M, C)
    cur_mc = curr_fea.reshape(B, M, C)
    f0, f1 = coattention(ref_mc, cur_mc)

    pooled = pooled_sum3_mean(f0, f1, cur_mc)                               # mean(f0+f1+cur)
    att = channel_attention(pooled, params)                                 # (B, 3, C) softmax
    x = attention_combine(f0, f1, cur_mc, att).reshape(B, h, w, C)

    y = conv_bn_act(x, params["cls1_w"], params["cls1_b"], True, act="relu")
    logits = conv_bn_act(y, params["cls2_w"], params["cls2_b"], use_bn=False, act=None)
    pred = bilinear_resize(logits, in_h, in_w, align_corners=False,
                           act="sigmoid", out_dtype=jnp.float32)

    to_nchw = lambda t: jnp.transpose(t, (0, 3, 1, 2))
    return to_nchw(pred), to_nchw(temp), to_nchw(heat)


# ----------------------------------------------------------------------------
# Deterministic parameter construction (weights ~ N(0, 0.01); conv biases zero except
# fc[-1].bias = -2.19; BN identity, matching the module's init loop).
# ----------------------------------------------------------------------------
class ParamGen:
    def __init__(self, key):
        self.key = key

    def normal(self, shape, std=0.01):
        self.key, sub = jax.random.split(self.key)
        return jax.random.normal(sub, shape, jnp.float32) * std


def make_params(key, layers=(1, 1, 1, 1), num_classes=2, all_channel=256):
    pg = ParamGen(key)
    zeros = lambda n: jnp.zeros((n,), jnp.float32)
    params = {"conv1_w": pg.normal((64, 3, 7, 7))}
    inplanes = [64]

    def make_layer(planes, blocks, stride=1, dilation=1):
        blist = []
        has_ds = (stride != 1 or inplanes[0] != planes * 4
                  or dilation == 2 or dilation == 4)
        p = {"w1": pg.normal((planes, inplanes[0], 1, 1)),
             "w2": pg.normal((planes, planes, 3, 3)),
             "w3": pg.normal((planes * 4, planes, 1, 1)),
             "stride": stride, "dilation": dilation}
        if has_ds:
            p["wd"] = pg.normal((planes * 4, inplanes[0], 1, 1))
        blist.append(p)
        inplanes[0] = planes * 4
        for _ in range(1, blocks):
            blist.append({"w1": pg.normal((planes, inplanes[0], 1, 1)),
                          "w2": pg.normal((planes, planes, 3, 3)),
                          "w3": pg.normal((planes * 4, planes, 1, 1)),
                          "stride": 1, "dilation": dilation})
        return blist

    params["layer1"] = make_layer(64, layers[0])
    params["layer2"] = make_layer(128, layers[1], stride=2)
    params["layer3"] = make_layer(256, layers[2], stride=1, dilation=2)
    params["layer4"] = make_layer(512, layers[3], stride=1, dilation=4)

    depth = 512
    params["aspp"] = {
        "conv_w": pg.normal((depth, 2048, 1, 1)), "conv_b": zeros(depth),
        "w0": pg.normal((depth, 2048, 1, 1)), "b0": zeros(depth),
        "w1": pg.normal((depth, 2048, 3, 3)), "b1": zeros(depth),
        "w2": pg.normal((depth, 2048, 3, 3)), "b2": zeros(depth),
        "w3": pg.normal((depth, 2048, 3, 3)), "b3": zeros(depth),
        "bw": pg.normal((256, depth * 5, 3, 3)), "bb": zeros(256),
        "prelu_w": jnp.full((256,), 0.25, jnp.float32),
    }
    params["cls_w"] = pg.normal((num_classes, 256, 1, 1))
    params["cls_b"] = zeros(num_classes)

    params["ups"] = {
        "u1_skip": pg.normal((256, 2048, 1, 1)),
        "u2_skip": pg.normal((256, 1024, 1, 1)), "u2_up": pg.normal((256, 256, 1, 1)),
        "u3_skip": pg.normal((256, 512, 1, 1)), "u3_up": pg.normal((256, 256, 1, 1)),
        "u4_skip": pg.normal((256, 256, 1, 1)), "u4_up": pg.normal((256, 256, 1, 1)),
        "u4_cross": pg.normal((64, 256, 1, 1)),
    }

    params["fc0_w"] = pg.normal((256, 64, 3, 3))
    params["fc0_b"] = zeros(256)
    params["fc1_w"] = pg.normal((1, 256, 1, 1))
    params["fc1_b"] = jnp.full((1,), -2.19, jnp.float32)
    params["mw_w"] = pg.normal((1, 64 + 1, 1, 1))
    params["mw_b"] = zeros(1)
    params["mb_w"] = pg.normal((1, 64 + 1, 1, 1))
    params["mb_b"] = zeros(1)
    params["ca1_w"] = pg.normal((all_channel // 16, all_channel, 1, 1))
    params["ca2_w"] = pg.normal((3 * all_channel, all_channel // 16, 1, 1))
    params["cls1_w"] = pg.normal((all_channel, all_channel, 1, 1))
    params["cls1_b"] = zeros(all_channel)
    params["cls2_w"] = pg.normal((num_classes, all_channel, 1, 1))
    params["cls2_b"] = zeros(num_classes)
    return params


# ----------------------------------------------------------------------------
if __name__ == "__main__":
    key = jax.random.PRNGKey(0)
    pkey, k1, k2, k3, k4, k5 = jax.random.split(key, 6)

    num_classes = 2
    params = make_params(pkey, layers=(1, 1, 1, 1), num_classes=num_classes)

    H = W = 32
    input1 = jax.random.normal(k1, (2, 3, H, W), jnp.float32)
    previous = jax.random.normal(k2, (2, 3, H, W), jnp.float32)   # unused by the reference forward
    input2 = jax.random.normal(k3, (2, 3, H, W), jnp.float32)
    ct = jax.random.uniform(k4, (2, 2), jnp.float32, 0.0, float(W))
    # input_guass must share the Upsample_module output spatial size (x1's 9x9 for 32x32 input)
    input_guass = jax.random.uniform(k5, (2, 1, 9, 9), jnp.float32)

    pred, temp, heat = coattention_forward(params, input1, previous, input2, ct, input_guass)
    jax.block_until_ready((pred, temp, heat))

    assert pred.shape == (2, num_classes, H, W), pred.shape
    assert temp.shape == (2, num_classes, H, W), temp.shape
    assert heat.shape == (2, 1, 9, 9), heat.shape
    assert bool(jnp.all(jnp.isfinite(pred))) and bool(jnp.all((pred >= 0) & (pred <= 1)))
    assert bool(jnp.all(jnp.isfinite(temp))) and bool(jnp.all((temp >= 0) & (temp <= 1)))
    assert bool(jnp.all(jnp.isfinite(heat)))

    print("KERNEL_OK")
</pallas_src>

<mosaic_0001>
module attributes {stable_mosaic.version = 11 : i64} {
  func.func @_mm_kernel(%arg0: i32, %arg1: i32, %arg2: i32, %arg3: memref<512x147xbf16, #tpu.memory_space<vmem>>, %arg4: memref<147x128xbf16, #tpu.memory_space<vmem>>, %arg5: memref<1x128xf32, #tpu.memory_space<vmem>>, %arg6: memref<1x128xf32, #tpu.memory_space<vmem>>, %arg7: memref<1x128xf32, #tpu.memory_space<vmem>>, %arg8: memref<512x128xbf16, #tpu.memory_space<vmem>>, %arg9: memref<512x128xf32, #tpu.memory_space<vmem>>) attributes {dimension_semantics = [#tpu.dimension_semantics<parallel>, #tpu.dimension_semantics<parallel>, #tpu.dimension_semantics<arbitrary>], iteration_bounds = array<i64: 1, 1, 1>, scalar_prefetch = 0 : i64, scratch_operands = 1 : i64, tpu.core_type = #tpu.core_type<tc>, window_params = [{transform_indices = @transform_0, window_bounds = array<i64: 512, 147>}, {transform_indices = @transform_1, window_bounds = array<i64: 147, 128>}, {transform_indices = @transform_2, window_bounds = array<i64: 1, 128>}, {transform_indices = @transform_3, window_bounds = array<i64: 1, 128>}, {transform_indices = @transform_4, window_bounds = array<i64: 1, 128>}, {transform_indices = @transform_5, window_bounds = array<i64: 512, 128>}]} {
    %c0_i32 = arith.constant 0 : i32
    %0 = arith.cmpi eq, %arg2, %c0_i32 : i32
    %1 = arith.extui %0 : i1 to i32
    %c0_i32_0 = arith.constant 0 : i32
    %2 = arith.cmpi ne, %1, %c0_i32_0 : i32
    scf.if %2 {
      %cst_10 = arith.constant 0.000000e+00 : f32
      %12 = vector.broadcast %cst_10 : f32 to vector<512x128xf32>
      %c0_11 = arith.constant 0 : index
      %c0_12 = arith.constant 0 : index
      %13 = vector.load %arg9[%c0_11, %c0_12] : memref<512x128xf32, #tpu.memory_space<vmem>>, vector<512x128xf32>
      tpu.vector_store %arg9[%c0_11, %c0_12], %12 {strides = array<i32>} : memref<512x128xf32, #tpu.memory_space<vmem>>, vector<512x128xf32>,
    } else {
    }
    %c0 = arith.constant 0 : index
    %c0_1 = arith.constant 0 : index
    %3 = vector.load %arg9[%c0, %c0_1] : memref<512x128xf32, #tpu.memory_space<vmem>>, vector<512x128xf32>
    %c0_2 = arith.constant 0 : index
    %c0_3 = arith.constant 0 : index
    %4 = vector.load %arg3[%c0_2, %c0_3] : memref<512x147xbf16, #tpu.memory_space<vmem>>, vector<512x147xbf16>
    %c0_4 = arith.constant 0 : index
    %c0_5 = arith.constant 0 : index
    %5 = vector.load %arg4[%c0_4, %c0_5] : memref<147x128xbf16, #tpu.memory_space<vmem>>, vector<147x128xbf16>
    %cst = arith.constant dense<0.000000e+00> : vector<512x128xf32>
    %6 = tpu.matmul %4, %5, %cst {dimension_numbers = #tpu.dot_dimension_numbers<[1], [0], [0], [1], [0, 0, 1, 1], [], []>} : vector<512x147xbf16>, vector<147x128xbf16>, vector<512x128xf32> -> vector<512x128xf32>
    %7 = arith.addf %3, %6 : vector<512x128xf32>
    %c0_6 = arith.constant 0 : index
    %c0_7 = arith.constant 0 : index
    %8 = vector.load %arg9[%c0_6, %c0_7] : memref<512x128xf32, #tpu.memory_space<vmem>>, vector<512x128xf32>
    tpu.vector_store %arg9[%c0_6, %c0_7], %7 {strides = array<i32>} : memref<512x128xf32, #tpu.memory_space<vmem>>, vector<512x128xf32>,
    %c0_i32_8 = arith.constant 0 : i32
    %9 = arith.cmpi eq, %arg2, %c0_i32_8 : i32
    %10 = arith.extui %9 : i1 to i32
    %c0_i32_9 = arith.constant 0 : i32
    %11 = arith.cmpi ne, %10, %c0_i32_9 : i32
    scf.if %11 {
      %c0_10 = arith.constant 0 : index
      %c0_11 = arith.constant 0 : index
      %12 = vector.load %arg9[%c0_10, %c0_11] : memref<512x128xf32, #tpu.memory_space<vmem>>, vector<512x128xf32>
      %c0_12 = arith.constant 0 : index
      %c0_13 = arith.constant 0 : index
      %13 = vector.load %arg5[%c0_12, %c0_13] : memref<1x128xf32, #tpu.memory_space<vmem>>, vector<1x128xf32>
      %14 = vector.broadcast %13 : vector<1x128xf32> to vector<512x128xf32>
      %15 = arith.mulf %12, %14 : vector<512x128xf32>
      %c0_14 = arith.constant 0 : index
      %c0_15 = arith.constant 0 : index
      %16 = vector.load %arg6[%c0_14, %c0_15] : memref<1x128xf32, #tpu.memory_space<vmem>>, vector<1x128xf32>
      %17 = vector.broadcast %16 : vector<1x128xf32> to vector<512x128xf32>
      %18 = arith.addf %15, %17 : vector<512x128xf32>
      %cst_16 = arith.constant 0.000000e+00 : f32
      %19 = vector.broadcast %cst_16 : f32 to vector<512x128xf32>
      %20 = arith.maximumf %18, %19 : vector<512x128xf32>
      %21 = arith.truncf %20 : vector<512x128xf32> to vector<512x128xbf16>
      %c0_17 = arith.constant 0 : index
      %c0_18 = arith.constant 0 : index
      %22 = vector.load %arg8[%c0_17, %c0_18] : memref<512x128xbf16, #tpu.memory_space<vmem>>, vector<512x128xbf16>
      tpu.vector_store %arg8[%c0_17, %c0_18], %21 {strides = array<i32>} : memref<512x128xbf16, #tpu.memory_space<vmem>>, vector<512x128xbf16>,
    } else {
    }
    return
  }
  func.func @transform_0(%arg0: i32, %arg1: i32, %arg2: i32) -> (i32, i32) {
    %c0_i32 = arith.constant 0 : i32
    return %arg0, %arg2 : i32, i32
  }
  func.func @transform_1(%arg0: i32, %arg1: i32, %arg2: i32) -> (i32, i32) {
    %c0_i32 = arith.constant 0 : i32
    return %arg2, %arg1 : i32, i32
  }
  func.func @transform_2(%arg0: i32, %arg1: i32, %arg2: i32) -> (i32, i32) {
    %c0_i32 = arith.constant 0 : i32
    %c0_i32_0 = arith.constant 0 : i32
    return %c0_i32, %arg1 : i32, i32
  }
  func.func @transform_3(%arg0: i32, %arg1: i32, %arg2: i32) -> (i32, i32) {
    %c0_i32 = arith.constant 0 : i32
    %c0_i32_0 = arith.constant 0 : i32
    return %c0_i32, %arg1 : i32, i32
  }
  func.func @transform_4(%arg0: i32, %arg1: i32, %arg2: i32) -> (i32, i32) {
    %c0_i32 = arith.constant 0 : i32
    %c0_i32_0 = arith.constant 0 : i32
    return %c0_i32, %arg1 : i32, i32
  }
  func.func @transform_5(%arg0: i32, %arg1: i32, %arg2: i32) -> (i32, i32) {
    %c0_i32 = arith.constant 0 : i32
    return %arg0, %arg1 : i32, i32
  }
}

</mosaic_0001>

<bundles_post_ra>
// kernel: tpu_custom_call.1
= control target key start
LH: loop header
LB: loop body
LE: loop exit
PB: predicated region body
PF: predicated region fallthrough
CT: control target
= control target key end

     0   :  { %v2294_v1 = vmov 0   ;;  %vm582_vm0 = vcmask 154624   ;;  %vm679_vm1 = vcmask 1040384   ;;  %vm680_vm2 = vcmask 1041408   ;;  %s2733_s0 = inlined_call_operand.vmem [shape: bf16[512,147], index: 0, kind: input, shape index: {}]   ;;  %s2734_s1 = inlined_call_operand.vmem [shape: bf16[147,128], index: 1, kind: input, shape index: {}]   ;;  %s2735_s2 = inlined_call_operand.vmem [shape: f32[1,128], index: 2, kind: input, shape index: {}]   ;;  %s2736_s3 = inlined_call_operand.vmem [shape: f32[1,128], index: 3, kind: input, shape index: {}]   ;;  %s2737_s4 = inlined_call_operand.vmem [shape: f32[1,128], index: 4, kind: input, shape index: {}]   ;;  %s2738_s5 = inlined_call_operand.hbm [shape: bf16[512,128], index: 5, kind: output, shape index: {}]  }
   0x1   :  { %v2164_v0 = vld [vmem:[%s2734_s1] sm:$0xff]   ;;  %686 = vmatprep.subr.bf16.mxu0 %v2294_v1  ;;  %2139 = vmatprep.subr.bf16.mxu1 %v2294_v1  ;;  %v2165_v2 = vld [vmem:[%s2734_s1 + $0x8] sm:$0xff]   ;;  %v2166_v3 = vld [vmem:[%s2734_s1 + $0x10] sm:$0xff]   ;;  %v2295_v11 = vmov 65535  }
   0x2   :  { %687 = vmatpush1.bf16.msra.mxu0 %v2164_v0  ;;  %2149 = vmatpush1.bf16.msra.mxu1 %v2164_v0  ;;  %v2167_v4 = vld [vmem:[%s2734_s1 + $0x18] sm:$0xff]   ;;  %v2176_v5 = vld [vmem:[%s2733_s0 + $0x4] ss:$8 sps:$4 sm:$0xff]   ;;  %v2170_v9 = vld [vmem:[%s2734_s1 + $0x30] sm:$0xff]   ;;  %v681_v12 = vsel %vm679_vm1, 4294967295, %v2295_v11 }
   0x3   :  { %688 = vmatprep.subr.bf16.mxu0 %v2294_v1  ;;  %2140 = vmatprep.subr.bf16.mxu1 %v2294_v1  ;;  %v2179_v6 = vld [vmem:[%s2733_s0 + $0x104] ss:$8 sps:$4 sm:$0xff]   ;;  %v2171_v10 = vld [vmem:[%s2734_s1 + $0x38] sm:$0xff]   ;;  %v2173_v14 = vld [vmem:[%s2734_s1 + $0x48] ss:$0 sps:$4 sm:$0x33]  }
   0x4   :  { %1786 = vmatprep.mubr.msk.bf16.mxu0 %vm582_vm0, %v2176_v5  ;;  %v2168_v7 = vld [vmem:[%s2734_s1 + $0x20] sm:$0xff]   ;;  %1802 = vmatprep.mubr.msk.bf16.mxu1 %vm582_vm0, %v2179_v6  ;;  %v2169_v8 = vld [vmem:[%s2734_s1 + $0x28] sm:$0xff]   ;;  %v682_v15 = vsel %vm680_vm2, %v681_v12, 0  ;;  %v2180_v19 = vld [vmem:[%s2733_s0 + $0x14] ss:$8 sps:$4 sm:$0xff]  }
   0x5   :  { %v2172_v13 = vld [vmem:[%s2734_s1 + $0x40] sm:$0xff]   ;;  %v684_v16 = vand.u32 %v2173_v14, %v682_v15  ;;  %v2182_v20 = vld [vmem:[%s2733_s0 + $0x114] ss:$8 sps:$4 sm:$0xff]   ;;  %v2184_v21 = vld [vmem:[%s2733_s0 + $0x10] ss:$8 sps:$4 sm:$0xff]  }
   0x6   :  { %689 = vmatpush1.bf16.msra.mxu0 %v2165_v2  ;;  %2150 = vmatpush1.bf16.msra.mxu1 %v2165_v2  ;;  %v2174_v17 = vld [vmem:[%s2733_s0] ss:$8 sps:$4 sm:$0xff]   ;;  %v2185_v22 = vld [vmem:[%s2733_s0 + $0x110] ss:$8 sps:$4 sm:$0xff]   ;;  %v2186_v23 = vld [vmem:[%s2733_s0 + $0x24] ss:$8 sps:$4 sm:$0xff]  }
   0x7   :  { %690 = vmatprep.subr.bf16.mxu0 %v2294_v1  ;;  %2141 = vmatprep.subr.bf16.mxu1 %v2294_v1  ;;  %v2177_v18 = vld [vmem:[%s2733_s0 + $0x100] ss:$8 sps:$4 sm:$0xff]   ;;  %v2188_v24 = vld [vmem:[%s2733_s0 + $0x124] ss:$8 sps:$4 sm:$0xff]  }
   0xa   :  { %691 = vmatpush1.bf16.msra.mxu0 %v2166_v3  ;;  %2151 = vmatpush1.bf16.msra.mxu1 %v2166_v3 }
   0xb   :  { %692 = vmatprep.subr.bf16.mxu0 %v2294_v1  ;;  %2142 = vmatprep.subr.bf16.mxu1 %v2294_v1 }
   0xe   :  { %693 = vmatpush1.bf16.msra.mxu0 %v2167_v4  ;;  %2152 = vmatpush1.bf16.msra.mxu1 %v2167_v4 }
   0xf   :  { %694 = vmatprep.subr.bf16.mxu0 %v2294_v1  ;;  %2143 = vmatprep.subr.bf16.mxu1 %v2294_v1 }
  0x12   :  { %695 = vmatpush1.bf16.msra.mxu0 %v2168_v7  ;;  %2153 = vmatpush1.bf16.msra.mxu1 %v2168_v7 }
  0x13   :  { %696 = vmatprep.subr.bf16.mxu0 %v2294_v1  ;;  %2144 = vmatprep.subr.bf16.mxu1 %v2294_v1 }
  0x16   :  { %697 = vmatpush1.bf16.msra.mxu0 %v2169_v8  ;;  %2154 = vmatpush1.bf16.msra.mxu1 %v2169_v8 }
  0x17   :  { %698 = vmatprep.subr.bf16.mxu0 %v2294_v1  ;;  %2145 = vmatprep.subr.bf16.mxu1 %v2294_v1 }
  0x1a   :  { %699 = vmatpush1.bf16.msra.mxu0 %v2170_v9  ;;  %2155 = vmatpush1.bf16.msra.mxu1 %v2170_v9 }
  0x1b   :  { %700 = vmatprep.subr.bf16.mxu0 %v2294_v1  ;;  %2146 = vmatprep.subr.bf16.mxu1 %v2294_v1 }
  0x1e   :  { %701 = vmatpush1.bf16.msra.mxu0 %v2171_v10  ;;  %2156 = vmatpush1.bf16.msra.mxu1 %v2171_v10 }
  0x1f   :  { %702 = vmatprep.subr.bf16.mxu0 %v2294_v1  ;;  %2147 = vmatprep.subr.bf16.mxu1 %v2294_v1 }
  0x22   :  { %703 = vmatpush1.bf16.msra.mxu0 %v2172_v13  ;;  %2157 = vmatpush1.bf16.msra.mxu1 %v2172_v13 }
  0x23   :  { %704 = vmatprep.subr.bf16.mxu0 %v2294_v1  ;;  %2148 = vmatprep.subr.bf16.mxu1 %v2294_v1 }
  0x26   :  { %705 = vmatpush1.bf16.msra.mxu0 %v684_v16  ;;  %2158 = vmatpush1.bf16.msra.mxu1 %v684_v16 }
  0x29   :  { %719 = vmatmul.mubr.bf16.vlgmr.msra.gmra.mrb[0].mxu0 %v2174_v17  ;;  %847 = vmatmul.mubr.bf16.vlgmr.msra.gmra.mrb[0].mxu1 %v2177_v18 }
  0x2a   :  { %1787 = vmatprep.mubr.msk.bf16.mxu0 %vm582_vm0, %v2180_v19  ;;  %1803 = vmatprep.mubr.msk.bf16.mxu1 %vm582_vm0, %v2182_v20 }
  0x31   :  { %727 = vmatmul.mubr.bf16.gmra.mrb[4].mxu0 %v2184_v21  ;;  %855 = vmatmul.mubr.bf16.gmra.mrb[4].mxu1 %v2185_v22 }
  0x32   :  { %1788 = vmatprep.mubr.msk.bf16.mxu0 %vm582_vm0, %v2186_v23  ;;  %1804 = vmatprep.mubr.msk.bf16.mxu1 %vm582_vm0, %v2188_v24 }
  0x33   :  { %10 = vsyncpa [#allocation4], 0  ;;  %v2190_v25 = vld [vmem:[%s2733_s0 + $0x20] ss:$8 sps:$4 sm:$0xff]   ;;  %v2192_v27 = vld [vmem:[%s2733_s0 + $0x34] ss:$8 sps:$4 sm:$0xff]  }
  0x34   :  { %v2191_v26 = vld [vmem:[%s2733_s0 + $0x120] ss:$8 sps:$4 sm:$0xff]   ;;  %v2194_v28 = vld [vmem:[%s2733_s0 + $0x134] ss:$8 sps:$4 sm:$0xff]   ;;  %v2196_v29 = vld [vmem:[%s2733_s0 + $0x30] ss:$8 sps:$4 sm:$0xff]  }
  0x35   :  { %v2197_v30 = vld [vmem:[%s2733_s0 + $0x130] ss:$8 sps:$4 sm:$0xff]   ;;  %v2198_v31 = vld [vmem:[%s2733_s0 + $0x44] ss:$8 sps:$4 sm:$0xff]   ;;  %v2202_v33 = vld [vmem:[%s2733_s0 + $0x40] ss:$8 sps:$4 sm:$0xff]  }
  0x36   :  { %v2200_v32 = vld [vmem:[%s2733_s0 + $0x144] ss:$8 sps:$4 sm:$0xff]   ;;  %v2203_v34 = vld [vmem:[%s2733_s0 + $0x140] ss:$8 sps:$4 sm:$0xff]   ;;  %v2204_v35 = vld [vmem:[%s2733_s0 + $0x54] ss:$8 sps:$4 sm:$0xff]  }
  0x37   :  { %v2206_v36 = vld [vmem:[%s2733_s0 + $0x154] ss:$8 sps:$4 sm:$0xff]   ;;  %v2208_v37 = vld [vmem:[%s2733_s0 + $0x50] ss:$8 sps:$4 sm:$0xff]   ;;  %v2210_v39 = vld [vmem:[%s2733_s0 + $0x64] ss:$8 sps:$4 sm:$0xff]  }
  0x38   :  { %v2209_v38 = vld [vmem:[%s2733_s0 + $0x150] ss:$8 sps:$4 sm:$0xff]   ;;  %v2212_v40 = vld [vmem:[%s2733_s0 + $0x164] ss:$8 sps:$4 sm:$0xff]   ;;  %v2214_v41 = vld [vmem:[%s2733_s0 + $0x60] ss:$8 sps:$4 sm:$0xff]  }
  0x39   :  { %735 = vmatmul.mubr.bf16.gmra.mrb[8].mxu0 %v2190_v25  ;;  %863 = vmatmul.mubr.bf16.gmra.mrb[8].mxu1 %v2191_v26  ;;  %v2215_v42 = vld [vmem:[%s2733_s0 + $0x160] ss:$8 sps:$4 sm:$0xff]   ;;  %v2216_v43 = vld [vmem:[%s2733_s0 + $0x74] ss:$8 sps:$4 sm:$0xff]   ;;  %v2220_v45 = vld [vmem:[%s2733_s0 + $0x70] ss:$8 sps:$4 sm:$0xff]  }
  0x3a   :  { %1789 = vmatprep.mubr.msk.bf16.mxu0 %vm582_vm0, %v2192_v27  ;;  %1805 = vmatprep.mubr.msk.bf16.mxu1 %vm582_vm0, %v2194_v28  ;;  %v2218_v44 = vld [vmem:[%s2733_s0 + $0x174] ss:$8 sps:$4 sm:$0xff]   ;;  %v2221_v46 = vld [vmem:[%s2733_s0 + $0x170] ss:$8 sps:$4 sm:$0xff]   ;;  %v2222_v47 = vld [vmem:[%s2733_s0 + $0x84] ss:$8 sps:$4 sm:$0xff]  }
  0x3b   :  { %v2224_v48 = vld [vmem:[%s2733_s0 + $0x184] ss:$8 sps:$4 sm:$0xff]   ;;  %v2226_v49 = vld [vmem:[%s2733_s0 + $0x80] ss:$8 sps:$4 sm:$0xff]   ;;  %v2228_v51 = vld [vmem:[%s2733_s0 + $0x94] ss:$8 sps:$4 sm:$0xff]  }
  0x3c   :  { %v2227_v50 = vld [vmem:[%s2733_s0 + $0x180] ss:$8 sps:$4 sm:$0xff]   ;;  %v2230_v52 = vld [vmem:[%s2733_s0 + $0x194] ss:$8 sps:$4 sm:$0xff]   ;;  %v2232_v53 = vld [vmem:[%s2733_s0 + $0x90] ss:$8 sps:$4 sm:$0xff]  }
  0x3d   :  { %v2233_v54 = vld [vmem:[%s2733_s0 + $0x190] ss:$8 sps:$4 sm:$0xff]   ;;  %v2234_v55 = vld [vmem:[%s2733_s0 + $0xa4] ss:$8 sps:$4 sm:$0xff]   ;;  %v2238_v57 = vld [vmem:[%s2733_s0 + $0xa0] ss:$8 sps:$4 sm:$0xff]  }
  0x3e   :  { %v2236_v56 = vld [vmem:[%s2733_s0 + $0x1a4] ss:$8 sps:$4 sm:$0xff]   ;;  %v2239_v58 = vld [vmem:[%s2733_s0 + $0x1a0] ss:$8 sps:$4 sm:$0xff]   ;;  %v2240_v59 = vld [vmem:[%s2733_s0 + $0xb4] ss:$8 sps:$4 sm:$0xff]  }
  0x3f   :  { %v2242_v60 = vld [vmem:[%s2733_s0 + $0x1b4] ss:$8 sps:$4 sm:$0xff]   ;;  %v2244_v61 = vld [vmem:[%s2733_s0 + $0xb0] ss:$8 sps:$4 sm:$0xff]   ;;  %v2246_v63 = vld [vmem:[%s2733_s0 + $0xc4] ss:$8 sps:$4 sm:$0xff]  }
  0x40   :  { %v2245_v62 = vld [vmem:[%s2733_s0 + $0x1b0] ss:$8 sps:$4 sm:$0xff]   ;;  %v2248_v0 = vld [vmem:[%s2733_s0 + $0x1c4] ss:$8 sps:$4 sm:$0xff]   ;;  %v2250_v1 = vld [vmem:[%s2733_s0 + $0xc0] ss:$8 sps:$4 sm:$0xff]  }
  0x41   :  { %743 = vmatmul.mubr.bf16.gmra.mrb[12].mxu0 %v2196_v29  ;;  %871 = vmatmul.mubr.bf16.gmra.mrb[12].mxu1 %v2197_v30  ;;  %v2251_v2 = vld [vmem:[%s2733_s0 + $0x1c0] ss:$8 sps:$4 sm:$0xff]   ;;  %v2252_v3 = vld [vmem:[%s2733_s0 + $0xd4] ss:$8 sps:$4 sm:$0xff]   ;;  %v2256_v5 = vld [vmem:[%s2733_s0 + $0xd0] ss:$8 sps:$4 sm:$0xff]  }
  0x42   :  { %1790 = vmatprep.mubr.msk.bf16.mxu0 %vm582_vm0, %v2198_v31  ;;  %1806 = vmatprep.mubr.msk.bf16.mxu1 %vm582_vm0, %v2200_v32  ;;  %v2254_v4 = vld [vmem:[%s2733_s0 + $0x1d4] ss:$8 sps:$4 sm:$0xff]   ;;  %v2257_v6 = vld [vmem:[%s2733_s0 + $0x1d0] ss:$8 sps:$4 sm:$0xff]   ;;  %v2258_v7 = vld [vmem:[%s2733_s0 + $0xe4] ss:$8 sps:$4 sm:$0xff]  }
  0x43   :  { %v2260_v8 = vld [vmem:[%s2733_s0 + $0x1e4] ss:$8 sps:$4 sm:$0xff]   ;;  %v2262_v9 = vld [vmem:[%s2733_s0 + $0xe0] ss:$8 sps:$4 sm:$0xff]   ;;  %v2264_v11 = vld [vmem:[%s2733_s0 + $0xf4] ss:$8 sps:$4 sm:$0xff]  }
  0x44   :  { %v2263_v10 = vld [vmem:[%s2733_s0 + $0x1e0] ss:$8 sps:$4 sm:$0xff]   ;;  %v2266_v12 = vld [vmem:[%s2733_s0 + $0x1f4] ss:$8 sps:$4 sm:$0xff]   ;;  %v2268_v13 = vld [vmem:[%s2733_s0 + $0xf0] ss:$8 sps:$4 sm:$0xff]  }
  0x45   :  { %v2269_v14 = vld [vmem:[%s2733_s0 + $0x1f0] ss:$8 sps:$4 sm:$0xff]   ;;  %v2586_v15 = vld [vmem:[%s2735_s2] ss:$0 sm:$0xff]  ;;  %s2296_s0 = smov [#allocation3]  }
  0x46   :  { %v2591_v17 = vld [vmem:[%s2736_s3] ss:$0 sm:$0xff]  ;;  %s1701_s2 = sshll.u32 %s2296_s0, 4  ;;  %s1702_s2 = int_to_ptr.vmem [resolvable:$true] %s1701_s2 }
  0x47   :  { %s2270_s3 = scalar_lea.vmem %s1702_s2, 4096  ;;  %p2275_p1 = scmp.lt.s32.totalorder %s1702_s2, %s1702_s2 }
  0x48   :  { %p2271_p0 = scmp.ne.s32.totalorder %s1702_s2, %s2270_s3  ;;  %p2276_p2 = scmp.lt.s32.totalorder %s2270_s3, %s2270_s3 }
  0x49   :  { %751 = vmatmul.mubr.bf16.gmra.mrb[16].mxu0 %v2202_v33  ;;  %879 = vmatmul.mubr.bf16.gmra.mrb[16].mxu1 %v2203_v34 }
  0x4a   :  { %1791 = vmatprep.mubr.msk.bf16.mxu0 %vm582_vm0, %v2204_v35  ;;  %1807 = vmatprep.mubr.msk.bf16.mxu1 %vm582_vm0, %v2206_v36  ;;  %p2277_p3 = por %p2276_p2, %p2275_p1 }
  0x4c   :  { %p2278_p4 = pnand %p2277_p3, %p2271_p0 }
  0x51   :  { %759 = vmatmul.mubr.bf16.gmra.mrb[20].mxu0 %v2208_v37  ;;  %887 = vmatmul.mubr.bf16.gmra.mrb[20].mxu1 %v2209_v38 }
  0x52   :  { %1792 = vmatprep.mubr.msk.bf16.mxu0 %vm582_vm0, %v2210_v39  ;;  %1808 = vmatprep.mubr.msk.bf16.mxu1 %vm582_vm0, %v2212_v40 }
  0x59   :  { %767 = vmatmul.mubr.bf16.gmra.mrb[24].mxu0 %v2214_v41  ;;  %895 = vmatmul.mubr.bf16.gmra.mrb[24].mxu1 %v2215_v42 }
  0x5a   :  { %1793 = vmatprep.mubr.msk.bf16.mxu0 %vm582_vm0, %v2216_v43  ;;  %1809 = vmatprep.mubr.msk.bf16.mxu1 %vm582_vm0, %v2218_v44 }
  0x61   :  { %775 = vmatmul.mubr.bf16.gmra.mrb[28].mxu0 %v2220_v45  ;;  %903 = vmatmul.mubr.bf16.gmra.mrb[28].mxu1 %v2221_v46 }
  0x62   :  { %1794 = vmatprep.mubr.msk.bf16.mxu0 %vm582_vm0, %v2222_v47  ;;  %1810 = vmatprep.mubr.msk.bf16.mxu1 %vm582_vm0, %v2224_v48 }
  0x69   :  { %783 = vmatmul.mubr.bf16.gmra.mrb[32].mxu0 %v2226_v49  ;;  %911 = vmatmul.mubr.bf16.gmra.mrb[32].mxu1 %v2227_v50 }
  0x6a   :  { %1795 = vmatprep.mubr.msk.bf16.mxu0 %vm582_vm0, %v2228_v51  ;;  %1811 = vmatprep.mubr.msk.bf16.mxu1 %vm582_vm0, %v2230_v52 }
  0x71   :  { %791 = vmatmul.mubr.bf16.gmra.mrb[36].mxu0 %v2232_v53  ;;  %919 = vmatmul.mubr.bf16.gmra.mrb[36].mxu1 %v2233_v54 }
  0x72   :  { %1796 = vmatprep.mubr.msk.bf16.mxu0 %vm582_vm0, %v2234_v55  ;;  %1812 = vmatprep.mubr.msk.bf16.mxu1 %vm582_vm0, %v2236_v56 }
  0x79   :  { %799 = vmatmul.mubr.bf16.gmra.mrb[40].mxu0 %v2238_v57  ;;  %927 = vmatmul.mubr.bf16.gmra.mrb[40].mxu1 %v2239_v58 }
  0x7a   :  { %1797 = vmatprep.mubr.msk.bf16.mxu0 %vm582_vm0, %v2240_v59  ;;  %1813 = vmatprep.mubr.msk.bf16.mxu1 %vm582_vm0, %v2242_v60 }
  0x81   :  { %807 = vmatmul.mubr.bf16.gmra.mrb[44].mxu0 %v2244_v61  ;;  %935 = vmatmul.mubr.bf16.gmra.mrb[44].mxu1 %v2245_v62 }
  0x82   :  { %1798 = vmatprep.mubr.msk.bf16.mxu0 %vm582_vm0, %v2246_v63  ;;  %1814 = vmatprep.mubr.msk.bf16.mxu1 %vm582_vm0, %v2248_v0 }
  0x89   :  { %815 = vmatmul.mubr.bf16.gmra.mrb[48].mxu0 %v2250_v1  ;;  %943 = vmatmul.mubr.bf16.gmra.mrb[48].mxu1 %v2251_v2 }
  0x8a   :  { %1799 = vmatprep.mubr.msk.bf16.mxu0 %vm582_vm0, %v2252_v3  ;;  %1815 = vmatprep.mubr.msk.bf16.mxu1 %vm582_vm0, %v2254_v4 }
  0x91   :  { %823 = vmatmul.mubr.bf16.gmra.mrb[52].mxu0 %v2256_v5  ;;  %951 = vmatmul.mubr.bf16.gmra.mrb[52].mxu1 %v2257_v6 }
  0x92   :  { %1800 = vmatprep.mubr.msk.bf16.mxu0 %vm582_vm0, %v2258_v7  ;;  %1816 = vmatprep.mubr.msk.bf16.mxu1 %vm582_vm0, %v2260_v8 }
  0x99   :  { %831 = vmatmul.mubr.bf16.gmra.mrb[56].mxu0 %v2262_v9  ;;  %959 = vmatmul.mubr.bf16.gmra.mrb[56].mxu1 %v2263_v10 }
  0x9a   :  { %1801 = vmatprep.mubr.msk.bf16.mxu0 %vm582_vm0, %v2264_v11  ;;  %1817 = vmatprep.mubr.msk.bf16.mxu1 %vm582_vm0, %v2266_v12 }
  0xa1   :  { %839 = vmatmul.mubr.bf16.gmra.mrb[60].mxu0 %v2268_v13  ;;  %967 = vmatmul.mubr.bf16.gmra.mrb[60].mxu1 %v2269_v14 }
  0xfc   :  { %v720_v16 = vpop.f32.mrb[0].mxu0  ;;  %v848_v18 = vpop.f32.mrb[0].mxu1 }
  0xfd   :  { %v1177_v19 = vmul.f32 %v2586_v15, %v720_v16  ;;  %v1209_v20 = vmul.f32 %v2586_v15, %v848_v18  ;;  %v722_v21 = vpop.f32.mrb[1].mxu0  ;;  %v850_v22 = vpop.f32.mrb[1].mxu1 }
  0xfe   :  { %v723_v23 = vpop.f32.mrb[2].mxu0  ;;  %v851_v24 = vpop.f32.mrb[2].mxu1 }
  0xff   :  { %v1248_v25 = vadd.f32 %v2591_v17, %v1177_v19  ;;  %v1280_v26 = vadd.f32 %v2591_v17, %v1209_v20  ;;  %v1178_v27 = vmul.f32 %v2586_v15, %v723_v23  ;;  %v1210_v28 = vmul.f32 %v2586_v15, %v851_v24  ;;  %v725_v29 = vpop.f32.mrb[3].mxu0  ;;  %v853_v30 = vpop.f32.mrb[3].mxu1 }
 0x101   :  { %v1249_v31 = vadd.f32 %v2591_v17, %v1178_v27  ;;  %v1281_v32 = vadd.f32 %v2591_v17, %v1210_v28  ;;  %v1312_v33 = vmax.f32 %v1248_v25, 0.0  ;;  %v1344_v34 = vmax.f32 %v1280_v26, 0.0 }
 0x103   :  { %v1313_v35 = vmax.f32 %v1249_v31, 0.0  ;;  %v1345_v36 = vmax.f32 %v1281_v32, 0.0 }
 0x104   :  { %v728_v37 = vpop.f32.mrb[4].mxu0  ;;  %v856_v38 = vpop.f32.mrb[4].mxu1 }
 0x105   :  { %v1951_v39 = vpack.c.bf16 %v1313_v35, %v1312_v33  ;;  %v2031_v40 = vpack.c.bf16 %v1345_v36, %v1344_v34  ;;  %v1179_v41 = vmul.f32 %v2586_v15, %v728_v37  ;;  %v1211_v42 = vmul.f32 %v2586_v15, %v856_v38  ;;  %v730_v43 = vpop.f32.mrb[5].mxu0  ;;  %v858_v44 = vpop.f32.mrb[5].mxu1 }
 0x106   :  { %v731_v45 = vpop.f32.mrb[6].mxu0  ;;  %v859_v46 = vpop.f32.mrb[6].mxu1 }
 0x107   :  { %1952 = vst [vmem:[#allocation3] sm:$0xff] %v1951_v39   ;;  %2123 = vst [vmem:[#allocation3 + $0x80] sm:$0xff] %v2031_v40   ;;  %v1250_v47 = vadd.f32 %v2591_v17, %v1179_v41  ;;  %v1282_v48 = vadd.f32 %v2591_v17, %v1211_v42  ;;  %v1180_v49 = vmul.f32 %v2586_v15, %v731_v45  ;;  %v733_v51 = vpop.f32.mrb[7].mxu0  ;;  %v861_v52 = vpop.f32.mrb[7].mxu1 }
 0x108   :  { %v1212_v50 = vmul.f32 %v2586_v15, %v859_v46 }
 0x109   :  { %v1251_v53 = vadd.f32 %v2591_v17, %v1180_v49  ;;  %v1314_v55 = vmax.f32 %v1250_v47, 0.0  ;;  %v1346_v56 = vmax.f32 %v1282_v48, 0.0 }
 0x10a   :  { %v1283_v54 = vadd.f32 %v2591_v17, %v1212_v50 }
 0x10b   :  { %v1315_v57 = vmax.f32 %v1251_v53, 0.0 }
 0x10c   :  { %v1347_v58 = vmax.f32 %v1283_v54, 0.0  ;;  %v736_v59 = vpop.f32.mrb[8].mxu0  ;;  %v864_v60 = vpop.f32.mrb[8].mxu1 }
 0x10d   :  { %v1956_v61 = vpack.c.bf16 %v1315_v57, %v1314_v55  ;;  %v1181_v63 = vmul.f32 %v2586_v15, %v736_v59  ;;  %v1213_v0 = vmul.f32 %v2586_v15, %v864_v60  ;;  %v738_v1 = vpop.f32.mrb[9].mxu0  ;;  %v866_v2 = vpop.f32.mrb[9].mxu1 }
 0x10e   :  { %v2036_v62 = vpack.c.bf16 %v1347_v58, %v1346_v56  ;;  %v739_v3 = vpop.f32.mrb[10].mxu0  ;;  %v867_v4 = vpop.f32.mrb[10].mxu1 }
 0x10f   :  { %2108 = vst [vmem:[#allocation3 + $0x8] sm:$0xff] %v1956_v61   ;;  %v1252_v5 = vadd.f32 %v2591_v17, %v1181_v63  ;;  %v1284_v6 = vadd.f32 %v2591_v17, %v1213_v0  ;;  %v1182_v7 = vmul.f32 %v2586_v15, %v739_v3  ;;  %v1214_v8 = vmul.f32 %v2586_v15, %v867_v4  ;;  %v741_v9 = vpop.f32.mrb[11].mxu0  ;;  %v869_v10 = vpop.f32.mrb[11].mxu1 }
 0x110   :  { %2124 = vst [vmem:[#allocation3 + $0x88] sm:$0xff] %v2036_v62  }
 0x111   :  { %v1253_v11 = vadd.f32 %v2591_v17, %v1182_v7  ;;  %v1285_v12 = vadd.f32 %v2591_v17, %v1214_v8  ;;  %v1316_v13 = vmax.f32 %v1252_v5, 0.0  ;;  %v1348_v14 = vmax.f32 %v1284_v6, 0.0 }
 0x113   :  { %v1317_v16 = vmax.f32 %v1253_v11, 0.0  ;;  %v1349_v18 = vmax.f32 %v1285_v12, 0.0 }
 0x114   :  { %v744_v19 = vpop.f32.mrb[12].mxu0  ;;  %v872_v20 = vpop.f32.mrb[12].mxu1 }
 0x115   :  { %v1961_v21 = vpack.c.bf16 %v1317_v16, %v1316_v13  ;;  %v2041_v22 = vpack.c.bf16 %v1349_v18, %v1348_v14  ;;  %v1183_v23 = vmul.f32 %v2586_v15, %v744_v19  ;;  %v1215_v24 = vmul.f32 %v2586_v15, %v872_v20  ;;  %v746_v25 = vpop.f32.mrb[13].mxu0  ;;  %v874_v26 = vpop.f32.mrb[13].mxu1 }
 0x116   :  { %v747_v27 = vpop.f32.mrb[14].mxu0  ;;  %v875_v28 = vpop.f32.mrb[14].mxu1 }
 0x117   :  { %2109 = vst [vmem:[#allocation3 + $0x10] sm:$0xff] %v1961_v21   ;;  %2125 = vst [vmem:[#allocation3 + $0x90] sm:$0xff] %v2041_v22   ;;  %v1254_v29 = vadd.f32 %v2591_v17, %v1183_v23  ;;  %v1286_v30 = vadd.f32 %v2591_v17, %v1215_v24  ;;  %v1184_v31 = vmul.f32 %v2586_v15, %v747_v27  ;;  %v749_v33 = vpop.f32.mrb[15].mxu0  ;;  %v877_v34 = vpop.f32.mrb[15].mxu1 }
 0x118   :  { %v1216_v32 = vmul.f32 %v2586_v15, %v875_v28 }
 0x119   :  { %v1255_v35 = vadd.f32 %v2591_v17, %v1184_v31  ;;  %v1318_v37 = vmax.f32 %v1254_v29, 0.0  ;;  %v1350_v38 = vmax.f32 %v1286_v30, 0.0 }
 0x11a   :  { %v1287_v36 = vadd.f32 %v2591_v17, %v1216_v32 }
 0x11b   :  { %v1319_v39 = vmax.f32 %v1255_v35, 0.0 }
 0x11c   :  { %v1351_v40 = vmax.f32 %v1287_v36, 0.0  ;;  %v752_v41 = vpop.f32.mrb[16].mxu0  ;;  %v880_v42 = vpop.f32.mrb[16].mxu1 }
 0x11d   :  { %v1966_v43 = vpack.c.bf16 %v1319_v39, %v1318_v37  ;;  %v1185_v45 = vmul.f32 %v2586_v15, %v752_v41  ;;  %v1217_v46 = vmul.f32 %v2586_v15, %v880_v42  ;;  %v754_v47 = vpop.f32.mrb[17].mxu0  ;;  %v882_v48 = vpop.f32.mrb[17].mxu1 }
 0x11e   :  { %v2046_v44 = vpack.c.bf16 %v1351_v40, %v1350_v38  ;;  %v755_v49 = vpop.f32.mrb[18].mxu0  ;;  %v883_v50 = vpop.f32.mrb[18].mxu1 }
 0x11f   :  { %2110 = vst [vmem:[#allocation3 + $0x18] sm:$0xff] %v1966_v43   ;;  %v1256_v51 = vadd.f32 %v2591_v17, %v1185_v45  ;;  %v1288_v52 = vadd.f32 %v2591_v17, %v1217_v46  ;;  %v1186_v53 = vmul.f32 %v2586_v15, %v755_v49  ;;  %v1218_v54 = vmul.f32 %v2586_v15, %v883_v50  ;;  %v757_v55 = vpop.f32.mrb[19].mxu0  ;;  %v885_v56 = vpop.f32.mrb[19].mxu1 }
 0x120   :  { %2126 = vst [vmem:[#allocation3 + $0x98] sm:$0xff] %v2046_v44  }
 0x121   :  { %v1257_v57 = vadd.f32 %v2591_v17, %v1186_v53  ;;  %v1289_v58 = vadd.f32 %v2591_v17, %v1218_v54  ;;  %v1320_v59 = vmax.f32 %v1256_v51, 0.0  ;;  %v1352_v60 = vmax.f32 %v1288_v52, 0.0 }
 0x123   :  { %v1321_v61 = vmax.f32 %v1257_v57, 0.0  ;;  %v1353_v62 = vmax.f32 %v1289_v58, 0.0 }
 0x124   :  { %v760_v63 = vpop.f32.mrb[20].mxu0  ;;  %v888_v0 = vpop.f32.mrb[20].mxu1 }
 0x125   :  { %v1971_v1 = vpack.c.bf16 %v1321_v61, %v1320_v59  ;;  %v2051_v2 = vpack.c.bf16 %v1353_v62, %v1352_v60  ;;  %v1187_v3 = vmul.f32 %v2586_v15, %v760_v63  ;;  %v1219_v4 = vmul.f32 %v2586_v15, %v888_v0  ;;  %v762_v5 = vpop.f32.mrb[21].mxu0  ;;  %v890_v6 = vpop.f32.mrb[21].mxu1 }
 0x126   :  { %v763_v7 = vpop.f32.mrb[22].mxu0  ;;  %v891_v8 = vpop.f32.mrb[22].mxu1 }
 0x127   :  { %2111 = vst [vmem:[#allocation3 + $0x20] sm:$0xff] %v1971_v1   ;;  %2127 = vst [vmem:[#allocation3 + $0xa0] sm:$0xff] %v2051_v2   ;;  %v1258_v9 = vadd.f32 %v2591_v17, %v1187_v3  ;;  %v1290_v10 = vadd.f32 %v2591_v17, %v1219_v4  ;;  %v1188_v11 = vmul.f32 %v2586_v15, %v763_v7  ;;  %v765_v13 = vpop.f32.mrb[23].mxu0  ;;  %v893_v14 = vpop.f32.mrb[23].mxu1 }
 0x128   :  { %v1220_v12 = vmul.f32 %v2586_v15, %v891_v8 }
 0x129   :  { %v1259_v16 = vadd.f32 %v2591_v17, %v1188_v11  ;;  %v1322_v19 = vmax.f32 %v1258_v9, 0.0  ;;  %v1354_v20 = vmax.f32 %v1290_v10, 0.0 }
 0x12a   :  { %v1291_v18 = vadd.f32 %v2591_v17, %v1220_v12 }
 0x12b   :  { %v1323_v21 = vmax.f32 %v1259_v16, 0.0 }
 0x12c   :  { %v1355_v22 = vmax.f32 %v1291_v18, 0.0  ;;  %v768_v23 = vpop.f32.mrb[24].mxu0  ;;  %v896_v24 = vpop.f32.mrb[24].mxu1 }
 0x12d   :  { %v1976_v25 = vpack.c.bf16 %v1323_v21, %v1322_v19  ;;  %v1189_v27 = vmul.f32 %v2586_v15, %v768_v23  ;;  %v1221_v28 = vmul.f32 %v2586_v15, %v896_v24  ;;  %v770_v29 = vpop.f32.mrb[25].mxu0  ;;  %v898_v30 = vpop.f32.mrb[25].mxu1 }
 0x12e   :  { %v2056_v26 = vpack.c.bf16 %v1355_v22, %v1354_v20  ;;  %v771_v31 = vpop.f32.mrb[26].mxu0  ;;  %v899_v32 = vpop.f32.mrb[26].mxu1 }
 0x12f   :  { %2112 = vst [vmem:[#allocation3 + $0x28] sm:$0xff] %v1976_v25   ;;  %v1260_v33 = vadd.f32 %v2591_v17, %v1189_v27  ;;  %v1292_v34 = vadd.f32 %v2591_v17, %v1221_v28  ;;  %v1190_v35 = vmul.f32 %v2586_v15, %v771_v31  ;;  %v1222_v36 = vmul.f32 %v2586_v15, %v899_v32  ;;  %v773_v37 = vpop.f32.mrb[27].mxu0  ;;  %v901_v38 = vpop.f32.mrb[27].mxu1 }
 0x130   :  { %2128 = vst [vmem:[#allocation3 + $0xa8] sm:$0xff] %v2056_v26  }
 0x131   :  { %v1261_v39 = vadd.f32 %v2591_v17, %v1190_v35  ;;  %v1293_v40 = vadd.f32 %v2591_v17, %v1222_v36  ;;  %v1324_v41 = vmax.f32 %v1260_v33, 0.0  ;;  %v1356_v42 = vmax.f32 %v1292_v34, 0.0 }
 0x133   :  { %v1325_v43 = vmax.f32 %v1261_v39, 0.0  ;;  %v1357_v44 = vmax.f32 %v1293_v40, 0.0 }
 0x134   :  { %v776_v45 = vpop.f32.mrb[28].mxu0  ;;  %v904_v46 = vpop.f32.mrb[28].mxu1 }
 0x135   :  { %v1981_v47 = vpack.c.bf16 %v1325_v43, %v1324_v41  ;;  %v2061_v48 = vpack.c.bf16 %v1357_v44, %v1356_v42  ;;  %v1191_v49 = vmul.f32 %v2586_v15, %v776_v45  ;;  %v1223_v50 = vmul.f32 %v2586_v15, %v904_v46  ;;  %v778_v51 = vpop.f32.mrb[29].mxu0  ;;  %v906_v52 = vpop.f32.mrb[29].mxu1 }
 0x136   :  { %v779_v53 = vpop.f32.mrb[30].mxu0  ;;  %v907_v54 = vpop.f32.mrb[30].mxu1 }
 0x137   :  { %2113 = vst [vmem:[#allocation3 + $0x30] sm:$0xff] %v1981_v47   ;;  %2129 = vst [vmem:[#allocation3 + $0xb0] sm:$0xff] %v2061_v48   ;;  %v1262_v55 = vadd.f32 %v2591_v17, %v1191_v49  ;;  %v1294_v56 = vadd.f32 %v2591_v17, %v1223_v50  ;;  %v1192_v57 = vmul.f32 %v2586_v15, %v779_v53  ;;  %v781_v59 = vpop.f32.mrb[31].mxu0  ;;  %v909_v60 = vpop.f32.mrb[31].mxu1 }
 0x138   :  { %v1224_v58 = vmul.f32 %v2586_v15, %v907_v54 }
 0x139   :  { %v1263_v61 = vadd.f32 %v2591_v17, %v1192_v57  ;;  %v1326_v63 = vmax.f32 %v1262_v55, 0.0  ;;  %v1358_v0 = vmax.f32 %v1294_v56, 0.0 }
 0x13a   :  { %v1295_v62 = vadd.f32 %v2591_v17, %v1224_v58 }
 0x13b   :  { %v1327_v1 = vmax.f32 %v1263_v61, 0.0 }
 0x13c   :  { %v1359_v2 = vmax.f32 %v1295_v62, 0.0  ;;  %v784_v3 = vpop.f32.mrb[32].mxu0  ;;  %v912_v4 = vpop.f32.mrb[32].mxu1 }
 0x13d   :  { %v1986_v5 = vpack.c.bf16 %v1327_v1, %v1326_v63  ;;  %v1193_v7 = vmul.f32 %v2586_v15, %v784_v3  ;;  %v1225_v8 = vmul.f32 %v2586_v15, %v912_v4  ;;  %v786_v9 = vpop.f32.mrb[33].mxu0  ;;  %v914_v10 = vpop.f32.mrb[33].mxu1 }
 0x13e   :  { %v2066_v6 = vpack.c.bf16 %v1359_v2, %v1358_v0  ;;  %v787_v11 = vpop.f32.mrb[34].mxu0  ;;  %v915_v12 = vpop.f32.mrb[34].mxu1 }
 0x13f   :  { %2114 = vst [vmem:[#allocation3 + $0x38] sm:$0xff] %v1986_v5   ;;  %v1264_v13 = vadd.f32 %v2591_v17, %v1193_v7  ;;  %v1296_v14 = vadd.f32 %v2591_v17, %v1225_v8  ;;  %v1194_v16 = vmul.f32 %v2586_v15, %v787_v11  ;;  %v1226_v18 = vmul.f32 %v2586_v15, %v915_v12  ;;  %v789_v19 = vpop.f32.mrb[35].mxu0  ;;  %v917_v20 = vpop.f32.mrb[35].mxu1 }
 0x140   :  { %2130 = vst [vmem:[#allocation3 + $0xb8] sm:$0xff] %v2066_v6  }
 0x141   :  { %v1265_v21 = vadd.f32 %v2591_v17, %v1194_v16  ;;  %v1297_v22 = vadd.f32 %v2591_v17, %v1226_v18  ;;  %v1328_v23 = vmax.f32 %v1264_v13, 0.0  ;;  %v1360_v24 = vmax.f32 %v1296_v14, 0.0 }
 0x143   :  { %v1329_v25 = vmax.f32 %v1265_v21, 0.0  ;;  %v1361_v26 = vmax.f32 %v1297_v22, 0.0 }
 0x144   :  { %v792_v27 = vpop.f32.mrb[36].mxu0  ;;  %v920_v28 = vpop.f32.mrb[36].mxu1 }
 0x145   :  { %v1991_v29 = vpack.c.bf16 %v1329_v25, %v1328_v23  ;;  %v2071_v30 = vpack.c.bf16 %v1361_v26, %v1360_v24  ;;  %v1195_v31 = vmul.f32 %v2586_v15, %v792_v27  ;;  %v1227_v32 = vmul.f32 %v2586_v15, %v920_v28  ;;  %v794_v33 = vpop.f32.mrb[37].mxu0  ;;  %v922_v34 = vpop.f32.mrb[37].mxu1 }
 0x146   :  { %v795_v35 = vpop.f32.mrb[38].mxu0  ;;  %v923_v36 = vpop.f32.mrb[38].mxu1 }
 0x147   :  { %2115 = vst [vmem:[#allocation3 + $0x40] sm:$0xff] %v1991_v29   ;;  %2131 = vst [vmem:[#allocation3 + $0xc0] sm:$0xff] %v2071_v30   ;;  %v1266_v37 = vadd.f32 %v2591_v17, %v1195_v31  ;;  %v1298_v38 = vadd.f32 %v2591_v17, %v1227_v32  ;;  %v1196_v39 = vmul.f32 %v2586_v15, %v795_v35  ;;  %v797_v41 = vpop.f32.mrb[39].mxu0  ;;  %v925_v42 = vpop.f32.mrb[39].mxu1 }
 0x148   :  { %v1228_v40 = vmul.f32 %v2586_v15, %v923_v36 }
 0x149   :  { %v1267_v43 = vadd.f32 %v2591_v17, %v1196_v39  ;;  %v1330_v45 = vmax.f32 %v1266_v37, 0.0  ;;  %v1362_v46 = vmax.f32 %v1298_v38, 0.0 }
 0x14a   :  { %v1299_v44 = vadd.f32 %v2591_v17, %v1228_v40 }
 0x14b   :  { %v1331_v47 = vmax.f32 %v1267_v43, 0.0 }
 0x14c   :  { %v1363_v48 = vmax.f32 %v1299_v44, 0.0  ;;  %v800_v49 = vpop.f32.mrb[40].mxu0  ;;  %v928_v50 = vpop.f32.mrb[40].mxu1 }
 0x14d   :  { %v1996_v51 = vpack.c.bf16 %v1331_v47, %v1330_v45  ;;  %v1197_v53 = vmul.f32 %v2586_v15, %v800_v49  ;;  %v1229_v54 = vmul.f32 %v2586_v15, %v928_v50  ;;  %v802_v55 = vpop.f32.mrb[41].mxu0  ;;  %v930_v56 = vpop.f32.mrb[41].mxu1 }
 0x14e   :  { %v2076_v52 = vpack.c.bf16 %v1363_v48, %v1362_v46  ;;  %v803_v57 = vpop.f32.mrb[42].mxu0  ;;  %v931_v58 = vpop.f32.mrb[42].mxu1 }
 0x14f   :  { %2116 = vst [vmem:[#allocation3 + $0x48] sm:$0xff] %v1996_v51   ;;  %v1268_v59 = vadd.f32 %v2591_v17, %v1197_v53  ;;  %v1300_v60 = vadd.f32 %v2591_v17, %v1229_v54  ;;  %v1198_v61 = vmul.f32 %v2586_v15, %v803_v57  ;;  %v1230_v62 = vmul.f32 %v2586_v15, %v931_v58  ;;  %v805_v63 = vpop.f32.mrb[43].mxu0  ;;  %v933_v0 = vpop.f32.mrb[43].mxu1 }
 0x150   :  { %2132 = vst [vmem:[#allocation3 + $0xc8] sm:$0xff] %v2076_v52  }
 0x151   :  { %v1269_v1 = vadd.f32 %v2591_v17, %v1198_v61  ;;  %v1301_v2 = vadd.f32 %v2591_v17, %v1230_v62  ;;  %v1332_v3 = vmax.f32 %v1268_v59, 0.0  ;;  %v1364_v4 = vmax.f32 %v1300_v60, 0.0 }
 0x153   :  { %v1333_v5 = vmax.f32 %v1269_v1, 0.0  ;;  %v1365_v6 = vmax.f32 %v1301_v2, 0.0 }
 0x154   :  { %v808_v7 = vpop.f32.mrb[44].mxu0  ;;  %v936_v8 = vpop.f32.mrb[44].mxu1 }
 0x155   :  { %v2001_v9 = vpack.c.bf16 %v1333_v5, %v1332_v3  ;;  %v2081_v10 = vpack.c.bf16 %v1365_v6, %v1364_v4  ;;  %v1199_v11 = vmul.f32 %v2586_v15, %v808_v7  ;;  %v1231_v12 = vmul.f32 %v2586_v15, %v936_v8  ;;  %v810_v13 = vpop.f32.mrb[45].mxu0  ;;  %v938_v14 = vpop.f32.mrb[45].mxu1 }
 0x156   :  { %v811_v16 = vpop.f32.mrb[46].mxu0  ;;  %v939_v18 = vpop.f32.mrb[46].mxu1 }
 0x157   :  { %2117 = vst [vmem:[#allocation3 + $0x50] sm:$0xff] %v2001_v9   ;;  %2133 = vst [vmem:[#allocation3 + $0xd0] sm:$0xff] %v2081_v10   ;;  %v1270_v19 = vadd.f32 %v2591_v17, %v1199_v11  ;;  %v1302_v20 = vadd.f32 %v2591_v17, %v1231_v12  ;;  %v1200_v21 = vmul.f32 %v2586_v15, %v811_v16  ;;  %v813_v23 = vpop.f32.mrb[47].mxu0  ;;  %v941_v24 = vpop.f32.mrb[47].mxu1 }
 0x158   :  { %v1232_v22 = vmul.f32 %v2586_v15, %v939_v18 }
 0x159   :  { %v1271_v25 = vadd.f32 %v2591_v17, %v1200_v21  ;;  %v1334_v27 = vmax.f32 %v1270_v19, 0.0  ;;  %v1366_v28 = vmax.f32 %v1302_v20, 0.0 }
 0x15a   :  { %v1303_v26 = vadd.f32 %v2591_v17, %v1232_v22 }
 0x15b   :  { %v1335_v29 = vmax.f32 %v1271_v25, 0.0 }
 0x15c   :  { %v1367_v30 = vmax.f32 %v1303_v26, 0.0  ;;  %v816_v31 = vpop.f32.mrb[48].mxu0  ;;  %v944_v32 = vpop.f32.mrb[48].mxu1 }
 0x15d   :  { %v2006_v33 = vpack.c.bf16 %v1335_v29, %v1334_v27  ;;  %v1201_v35 = vmul.f32 %v2586_v15, %v816_v31  ;;  %v1233_v36 = vmul.f32 %v2586_v15, %v944_v32  ;;  %v818_v37 = vpop.f32.mrb[49].mxu0  ;;  %v946_v38 = vpop.f32.mrb[49].mxu1 }
 0x15e   :  { %v2086_v34 = vpack.c.bf16 %v1367_v30, %v1366_v28  ;;  %v819_v39 = vpop.f32.mrb[50].mxu0  ;;  %v947_v40 = vpop.f32.mrb[50].mxu1 }
 0x15f   :  { %2118 = vst [vmem:[#allocation3 + $0x58] sm:$0xff] %v2006_v33   ;;  %v1272_v41 = vadd.f32 %v2591_v17, %v1201_v35  ;;  %v1304_v42 = vadd.f32 %v2591_v17, %v1233_v36  ;;  %v1202_v43 = vmul.f32 %v2586_v15, %v819_v39  ;;  %v1234_v44 = vmul.f32 %v2586_v15, %v947_v40  ;;  %v821_v45 = vpop.f32.mrb[51].mxu0  ;;  %v949_v46 = vpop.f32.mrb[51].mxu1 }
 0x160   :  { %2134 = vst [vmem:[#allocation3 + $0xd8] sm:$0xff] %v2086_v34  }
 0x161   :  { %v1273_v47 = vadd.f32 %v2591_v17, %v1202_v43  ;;  %v1305_v48 = vadd.f32 %v2591_v17, %v1234_v44  ;;  %v1336_v49 = vmax.f32 %v1272_v41, 0.0  ;;  %v1368_v50 = vmax.f32 %v1304_v42, 0.0 }
 0x163   :  { %v1337_v51 = vmax.f32 %v1273_v47, 0.0  ;;  %v1369_v52 = vmax.f32 %v1305_v48, 0.0 }
 0x164   :  { %v824_v53 = vpop.f32.mrb[52].mxu0  ;;  %v952_v54 = vpop.f32.mrb[52].mxu1 }
 0x165   :  { %v2011_v55 = vpack.c.bf16 %v1337_v51, %v1336_v49  ;;  %v2091_v56 = vpack.c.bf16 %v1369_v52, %v1368_v50  ;;  %v1203_v57 = vmul.f32 %v2586_v15, %v824_v53  ;;  %v1235_v58 = vmul.f32 %v2586_v15, %v952_v54  ;;  %v826_v59 = vpop.f32.mrb[53].mxu0  ;;  %v954_v60 = vpop.f32.mrb[53].mxu1 }
 0x166   :  { %v827_v61 = vpop.f32.mrb[54].mxu0  ;;  %v955_v62 = vpop.f32.mrb[54].mxu1 }
 0x167   :  { %2119 = vst [vmem:[#allocation3 + $0x60] sm:$0xff] %v2011_v55   ;;  %2135 = vst [vmem:[#allocation3 + $0xe0] sm:$0xff] %v2091_v56   ;;  %v1274_v63 = vadd.f32 %v2591_v17, %v1203_v57  ;;  %v1306_v0 = vadd.f32 %v2591_v17, %v1235_v58  ;;  %v1204_v1 = vmul.f32 %v2586_v15, %v827_v61  ;;  %v829_v3 = vpop.f32.mrb[55].mxu0  ;;  %v957_v4 = vpop.f32.mrb[55].mxu1 }
 0x168   :  { %v1236_v2 = vmul.f32 %v2586_v15, %v955_v62 }
 0x169   :  { %v1275_v5 = vadd.f32 %v2591_v17, %v1204_v1  ;;  %v1338_v7 = vmax.f32 %v1274_v63, 0.0  ;;  %v1370_v8 = vmax.f32 %v1306_v0, 0.0 }
 0x16a   :  { %v1307_v6 = vadd.f32 %v2591_v17, %v1236_v2 }
 0x16b   :  { %v1339_v9 = vmax.f32 %v1275_v5, 0.0 }
 0x16c   :  { %v1371_v10 = vmax.f32 %v1307_v6, 0.0  ;;  %v832_v11 = vpop.f32.mrb[56].mxu0  ;;  %v960_v12 = vpop.f32.mrb[56].mxu1 }
 0x16d   :  { %v2016_v13 = vpack.c.bf16 %v1339_v9, %v1338_v7  ;;  %v1205_v16 = vmul.f32 %v2586_v15, %v832_v11  ;;  %v1237_v18 = vmul.f32 %v2586_v15, %v960_v12  ;;  %v834_v19 = vpop.f32.mrb[57].mxu0  ;;  %v962_v20 = vpop.f32.mrb[57].mxu1 }
 0x16e   :  { %v2096_v14 = vpack.c.bf16 %v1371_v10, %v1370_v8  ;;  %v835_v21 = vpop.f32.mrb[58].mxu0  ;;  %v963_v22 = vpop.f32.mrb[58].mxu1 }
 0x16f   :  { %2120 = vst [vmem:[#allocation3 + $0x68] sm:$0xff] %v2016_v13   ;;  %v1276_v23 = vadd.f32 %v2591_v17, %v1205_v16  ;;  %v1308_v24 = vadd.f32 %v2591_v17, %v1237_v18  ;;  %v1206_v25 = vmul.f32 %v2586_v15, %v835_v21  ;;  %v1238_v26 = vmul.f32 %v2586_v15, %v963_v22  ;;  %v837_v27 = vpop.f32.mrb[59].mxu0  ;;  %v965_v28 = vpop.f32.mrb[59].mxu1 }
 0x170   :  { %2136 = vst [vmem:[#allocation3 + $0xe8] sm:$0xff] %v2096_v14  }
 0x171   :  { %v1277_v29 = vadd.f32 %v2591_v17, %v1206_v25  ;;  %v1309_v30 = vadd.f32 %v2591_v17, %v1238_v26  ;;  %v1340_v31 = vmax.f32 %v1276_v23, 0.0  ;;  %v1372_v32 = vmax.f32 %v1308_v24, 0.0 }
 0x173   :  { %v1341_v33 = vmax.f32 %v1277_v29, 0.0  ;;  %v1373_v34 = vmax.f32 %v1309_v30, 0.0 }
 0x174   :  { %v840_v35 = vpop.f32.mrb[60].mxu0  ;;  %v968_v36 = vpop.f32.mrb[60].mxu1 }
 0x175   :  { %v2021_v37 = vpack.c.bf16 %v1341_v33, %v1340_v31  ;;  %v2101_v38 = vpack.c.bf16 %v1373_v34, %v1372_v32  ;;  %v1207_v39 = vmul.f32 %v2586_v15, %v840_v35  ;;  %v1239_v40 = vmul.f32 %v2586_v15, %v968_v36  ;;  %v842_v41 = vpop.f32.mrb[61].mxu0  ;;  %v970_v42 = vpop.f32.mrb[61].mxu1 }
 0x176   :  { %v843_v43 = vpop.f32.mrb[62].mxu0  ;;  %v971_v44 = vpop.f32.mrb[62].mxu1 }
 0x177   :  { %2121 = vst [vmem:[#allocation3 + $0x70] sm:$0xff] %v2021_v37   ;;  %2137 = vst [vmem:[#allocation3 + $0xf0] sm:$0xff] %v2101_v38   ;;  %v1278_v45 = vadd.f32 %v2591_v17, %v1207_v39  ;;  %v1310_v46 = vadd.f32 %v2591_v17, %v1239_v40  ;;  %v1208_v47 = vmul.f32 %v2586_v15, %v843_v43  ;;  %v845_v49 = vpop.f32.mrb[63].mxu0  ;;  %v973_v50 = vpop.f32.mrb[63].mxu1 }
 0x178   :  { %v1240_v48 = vmul.f32 %v2586_v15, %v971_v44 }
 0x179   :  { %v1279_v51 = vadd.f32 %v2591_v17, %v1208_v47  ;;  %v1342_v53 = vmax.f32 %v1278_v45, 0.0  ;;  %v1374_v54 = vmax.f32 %v1310_v46, 0.0 }
 0x17a   :  { %v1311_v52 = vadd.f32 %v2591_v17, %v1240_v48 }
 0x17b   :  { %v1343_v55 = vmax.f32 %v1279_v51, 0.0 }
 0x17c   :  { %v1375_v56 = vmax.f32 %v1311_v52, 0.0 }
 0x17d   :  { %v2026_v57 = vpack.c.bf16 %v1343_v55, %v1342_v53 }
 0x17e   :  { %v2106_v58 = vpack.c.bf16 %v1375_v56, %v1374_v54 }
 0x17f   :  { %2122 = vst [vmem:[#allocation3 + $0x78] sm:$0xff] %v2026_v57  }
 0x180   :  { %2138 = vst [vmem:[#allocation3 + $0xf8] sm:$0xff] %v2106_v58  }
 0x181   :  { %2281 = shalt.err (!%p2278_p4)
}
 0x182   :  { %s2282_s11 = scalar_lea.hbm %s2738_s5, 4096 }
 0x183   :  { %p2283_p5 = scmp.ne.s32.totalorder %s2738_s5, %s2282_s11  ;;  %p2286_p6 = scmp.lt.u32.totalorder %s2282_s11, %s2738_s5 }
 0x185   :  { %p2288_p7 = pnand %p2286_p6, %p2283_p5 }
 0x187   :  { %2291 = shalt.err (!%p2288_p7)
}
 0x188   :  { %s2297_s16 = smov 64   ;;  %s2298_s17 = smov 4  }
 0x189   :  { %1707 = dma.vmem_to_hbm [thread:$0]  %s1702_s2, 4096, %s2738_s5, [#allocation4], %s2297_s16, %s2297_s16, %s2298_s17  }
 0x18a   :  { %2292 = dma.done.wait [#allocation4], 4096  }
 0x18b   :  { %2293 = vsyncadd [#allocation4], 4294963200 }
 0x18c   :  { %1711 = vsyncpa [#allocation4], 1 }

</bundles_post_ra>
